<compile_context>
chip_gen: v7x
topology: tpu7x:2x2x1
jax: 0.10.0
libtpu: 0.0.40
codegen_flags: <defaults>
</compile_context>

<pallas_src>
import jax
import jax.numpy as jnp
from jax.experimental import pallas as pl
from jax.experimental.pallas import tpu as pltpu


def _round_up(x: int, m: int) -> int:
    return ((x + m - 1) // m) * m


def _resident_spec(shape):
    """Small constant operand: full array, same block every grid step."""
    nd = len(shape)
    return pl.BlockSpec(shape, lambda *_: (0,) * nd)


def _vmem_limit(block_bytes):
    """Scoped-VMEM limit from the (already buffer-counted) operand sizes,
    with 2x headroom for compiler scratch."""
    need = int(sum(block_bytes))
    return int(min(128 * 1024 * 1024, max(16 * 1024 * 1024, 2 * need)))


# ----------------------------------------------------------------------------
# Pallas kernels
# ----------------------------------------------------------------------------
def _projection_kernel(z_ref, w_ref, v0t_ref, v1t_ref, x_ref, f0_ref, f1t_ref):
    """Per-layer preamble, tiled over node rows (runs ONCE per layer):
         X = Z @ W            (T, Dout)
         f0 = X @ v0          (T, 1)
         f1^T = (X @ v1)^T    (1, T)   (no in-kernel transpose needed)."""
    x = jnp.dot(z_ref[...], w_ref[...], preferred_element_type=jnp.float32)
    x_ref[...] = x.astype(x_ref.dtype)
    f0_ref[...] = jax.lax.dot_general(
        x, v0t_ref[...], (((1,), (1,)), ((), ())),
        preferred_element_type=jnp.float32)
    f1t_ref[...] = jax.lax.dot_general(
        v1t_ref[...], x, (((1,), (1,)), ((), ())),
        preferred_element_type=jnp.float32)


def _make_attention_kernel(fuse_last: bool):
    """Fused GAT attention + aggregation + ELU (+ optional final linear).

    refs: (x_full, f0_tile, f1t_row, graph_rows, [W_last,] out_rows)
      x_full     : (Np, Dout)  precomputed X, VMEM resident
      f0_tile    : (T, 1)      X@v0 for this row tile
      f1t_row    : (1, Np)     (X@v1)^T for all nodes, VMEM resident
      graph_rows : (T, Np)     streamed adjacency row block
      W_last     : (Dout, Dlat) optional fused is_last linear
      out_rows   : (T, Dout) or (T, Dlat)
    """

    def kernel(*refs):
        if fuse_last:
            x_ref, f0_ref, f1t_ref, g_ref, wlast_ref, o_ref = refs
        else:
            x_ref, f0_ref, f1t_ref, g_ref, o_ref = refs

        g = g_ref[...].astype(jnp.float32)                 # (T, Np)
        e = g * (f0_ref[...] + f1t_ref[...])               # (T, Np)

        # torch: sparse softmax over graph edges of (sigmoid(E) - 0.5); the
        # exp(-0.5) factor cancels between numerator and row sum -> dropped.
        # Rows with no edges stay 0 (denom clamped to 1).
        p = jnp.where(g != 0.0, jnp.exp(jax.nn.sigmoid(e)), 0.0)
        denom = jnp.sum(p, axis=-1, keepdims=True)          # (T, 1)
        denom = jnp.where(denom > 0.0, denom, 1.0)
        inv = pl.reciprocal(denom, approx=True)             # EUP slot
        inv = inv * (2.0 - denom * inv)                     # Newton step -> ~f32

        # Aggregate first, then fold 1/denom in as a (T, Dout) rescale.
        x_full = x_ref[...]
        h = jnp.dot(p.astype(x_full.dtype), x_full,
                    preferred_element_type=jnp.float32) * inv

        # ELU(alpha=1); exp(min(h,0))-1 keeps the discarded branch finite.
        h = jnp.where(h > 0.0, h, jnp.exp(jnp.minimum(h, 0.0)) - 1.0)

        if fuse_last:  # final is_last GATlayer == plain linear, fused here
            h = jnp.dot(h, wlast_ref[...], preferred_element_type=jnp.float32)

        o_ref[...] = h.astype(o_ref.dtype)

    return kernel


def _linear_kernel(z_ref, w_ref, o_ref):
    """is_last GATlayer when it is the only layer: X = Z @ W."""
    o_ref[...] = jnp.dot(z_ref[...], w_ref[...],
                         preferred_element_type=jnp.float32).astype(o_ref.dtype)


# ----------------------------------------------------------------------------
# pallas_call wrappers
# ----------------------------------------------------------------------------
def _projection_call(z, w, v0t, v1t, *, row_tile, x_dtype):
    n_pad, d_in = z.shape
    d_out = w.shape[1]
    grid = (n_pad // row_tile,)

    block_bytes = [
        2 * row_tile * d_in * z.dtype.itemsize,
        2 * w.size * 4, 2 * v0t.size * 4, 2 * v1t.size * 4,
        2 * row_tile * d_out * jnp.dtype(x_dtype).itemsize,
        2 * row_tile * 4, 2 * row_tile * 4,
    ]
    return pl.pallas_call(
        _projection_kernel,
        out_shape=(jax.ShapeDtypeStruct((n_pad, d_out), x_dtype),
                   jax.ShapeDtypeStruct((n_pad, 1), jnp.float32),
                   jax.ShapeDtypeStruct((1, n_pad), jnp.float32)),
        grid=grid,
        in_specs=[pl.BlockSpec((row_tile, d_in), lambda i: (i, 0)),
                  _resident_spec(w.shape),
                  _resident_spec(v0t.shape),
                  _resident_spec(v1t.shape)],
        out_specs=(pl.BlockSpec((row_tile, d_out), lambda i: (i, 0)),
                   pl.BlockSpec((row_tile, 1), lambda i: (i, 0)),
                   pl.BlockSpec((1, row_tile), lambda i: (0, i))),
        compiler_params=pltpu.CompilerParams(
            dimension_semantics=("parallel",),
            vmem_limit_bytes=_vmem_limit(block_bytes)),
    )(z, w, v0t, v1t)


def _attention_call(x, f0, f1t, graph, w_last, *, row_tile):
    n_pad, d_out = x.shape
    out_dim = w_last.shape[1] if w_last is not None else d_out
    grid = (n_pad // row_tile,)

    in_specs = [
        _resident_spec(x.shape),                               # X, VMEM resident
        pl.BlockSpec((row_tile, 1), lambda i: (i, 0)),         # f0 row tile
        _resident_spec(f1t.shape),                             # f1^T row
        pl.BlockSpec((row_tile, n_pad), lambda i: (i, 0)),     # graph row block
    ]
    args = [x, f0, f1t, graph]
    if w_last is not None:
        in_specs.append(_resident_spec(w_last.shape))
        args.append(w_last)

    block_bytes = [
        2 * x.size * x.dtype.itemsize,
        2 * row_tile * 4,
        2 * f1t.size * 4,
        2 * row_tile * n_pad * graph.dtype.itemsize,
        2 * row_tile * out_dim * 4,
    ]
    if w_last is not None:
        block_bytes.append(2 * w_last.size * 4)

    return pl.pallas_call(
        _make_attention_kernel(fuse_last=w_last is not None),
        out_shape=jax.ShapeDtypeStruct((n_pad, out_dim), jnp.float32),
        grid=grid,
        in_specs=in_specs,
        out_specs=pl.BlockSpec((row_tile, out_dim), lambda i: (i, 0)),
        compiler_params=pltpu.CompilerParams(
            dimension_semantics=("parallel",),
            vmem_limit_bytes=_vmem_limit(block_bytes)),
    )(*args)


def _linear_call(z, w, *, row_tile):
    n_pad = z.shape[0]
    block_bytes = [2 * row_tile * z.shape[1] * 4, 2 * w.size * 4,
                   2 * row_tile * w.shape[1] * 4]
    return pl.pallas_call(
        _linear_kernel,
        out_shape=jax.ShapeDtypeStruct((n_pad, w.shape[1]), jnp.float32),
        grid=(n_pad // row_tile,),
        in_specs=[pl.BlockSpec((row_tile, z.shape[1]), lambda i: (i, 0)),
                  _resident_spec(w.shape)],
        out_specs=pl.BlockSpec((row_tile, w.shape[1]), lambda i: (i, 0)),
        compiler_params=pltpu.CompilerParams(
            dimension_semantics=("parallel",),
            vmem_limit_bytes=_vmem_limit(block_bytes)),
    )(z, w)


def gat_encoder_forward(node_features, graph, params, *, row_tile=128,
                        graph_dtype=None, use_bf16_matmul=False):
    """GATEncoder.forward.

    node_features : (N, input_dim) f32
    graph         : (N, N) dense adjacency (zeros = no edge)
    params        : list of (W, v0, v1); W (in, out), v0/v1 (out, 1).
                    The final layer is `is_last` (only its W is used).
    row_tile      : node rows per grid step (power of two <= 128).
    graph_dtype   : optional dtype for the streamed adjacency (bfloat16 is
                    exact for 0/1 adjacencies and halves the N^2 HBM traffic).
    use_bf16_matmul : bf16 operands (f32 accumulate) for the K=Np aggregation
                    matmul; faster on v6e/v7x MXUs, re-validate tolerances.
    """
    n = node_features.shape[0]
    num_layers = len(params)
    latent_dim = params[-1][0].shape[1]

    # Lane-dense padding: nodes to a multiple of 128, feature dims to 128.
    n_pad = _round_up(n, 128)
    rt = max(8, min(row_tile, 128))
    while rt > 8 and n_pad // rt < 2:       # keep >= 2 grid steps (megacore)
        rt //= 2

    def pad2(a, rows, cols):
        return jnp.pad(a, ((0, rows - a.shape[0]), (0, cols - a.shape[1])))

    padded_params = []
    for w, v0, v1 in params:
        d_in, d_out = w.shape
        d_in_p, d_out_p = _round_up(d_in, 128), _round_up(d_out, 128)
        padded_params.append((pad2(w, d_in_p, d_out_p),
                              pad2(v0.T, 1, d_out_p),
                              pad2(v1.T, 1, d_out_p)))

    z = pad2(node_features.astype(jnp.float32), n_pad,
             _round_up(node_features.shape[1], 128))
    g = pad2(graph, n_pad, n_pad)
    if graph_dtype is not None:
        g = g.astype(graph_dtype)

    if num_layers == 1:
        out = _linear_call(z, padded_params[0][0], row_tile=rt)
        return out[:n, :latent_dim]

    x_dtype = jnp.bfloat16 if use_bf16_matmul else jnp.float32
    for li in range(num_layers - 1):
        w_p, v0t, v1t = padded_params[li]
        # Hoisted per-layer projections: X = Z@W, f0 = X@v0, f1^T = (X@v1)^T.
        x, f0, f1t = _projection_call(z, w_p, v0t, v1t, row_tile=rt,
                                      x_dtype=x_dtype)
        w_last = padded_params[-1][0] if li == num_layers - 2 else None
        z = _attention_call(x, f0, f1t, g, w_last, row_tile=rt)

    return z[:n, :latent_dim]


# ----------------------------------------------------------------------------
# Parameter init (matches GATlayer.__init__: xavier_uniform_ on W, v0, v1)
# ----------------------------------------------------------------------------
def init_gat_encoder_params(key, input_dim, hidden_dims, latent_dim):
    dims = [input_dim] + list(hidden_dims) + [latent_dim]
    params = []
    for i in range(len(dims) - 1):
        fi, fo = dims[i], dims[i + 1]
        key, wk, v0k, v1k = jax.random.split(key, 4)
        wl = jnp.sqrt(6.0 / (fi + fo))
        w = jax.random.uniform(wk, (fi, fo), jnp.float32, -wl, wl)
        vl = jnp.sqrt(6.0 / (fo + 1))
        v0 = jax.random.uniform(v0k, (fo, 1), jnp.float32, -vl, vl)
        v1 = jax.random.uniform(v1k, (fo, 1), jnp.float32, -vl, vl)
        params.append((w, v0, v1))
    return params


# Pure-JAX reference (dense equivalent of the PyTorch module's forward).
def gat_encoder_reference(x, graph, params):
    hp = jax.lax.Precision.HIGHEST
    num_layers = len(params)
    z = x
    for li, (w, v0, v1) in enumerate(params):
        X = jnp.dot(z, w, precision=hp)
        if li != num_layers - 1:
            f0 = jnp.dot(X, v0, precision=hp)          # (N, 1)
            f1 = jnp.dot(X, v1, precision=hp)          # (N, 1)
            e = graph * (f0 + f1.T)
            mask = graph != 0.0
            p = jnp.where(mask, jnp.exp(jax.nn.sigmoid(e) - 0.5), 0.0)
            denom = jnp.sum(p, axis=1, keepdims=True)
            alphas = p / jnp.where(denom > 0.0, denom, 1.0)
            X = jnp.dot(alphas, X, precision=hp)
            X = jnp.where(X > 0.0, X, jnp.exp(jnp.minimum(X, 0.0)) - 1.0)
        z = X
    return z


# ----------------------------------------------------------------------------
# Main
# ----------------------------------------------------------------------------
if __name__ == "__main__":
    key = jax.random.PRNGKey(0)

    N = 256
    input_dim = 16
    hidden_dims = [32, 32]
    latent_dim = 8

    key, xk, gk = jax.random.split(key, 3)
    x = jax.random.normal(xk, (N, input_dim), jnp.float32)
    adj = (jax.random.uniform(gk, (N, N)) < 0.25).astype(jnp.float32)
    adj = jnp.maximum(adj, jnp.eye(N, dtype=jnp.float32))   # self loops

    params = init_gat_encoder_params(key, input_dim, hidden_dims, latent_dim)

    # Binary adjacency -> bf16 streaming is exact and halves graph HBM bytes.
    z = gat_encoder_forward(x, adj, params, row_tile=128,
                            graph_dtype=jnp.bfloat16, use_bf16_matmul=False)
    z = jax.block_until_ready(z)

    z_ref = gat_encoder_reference(x, adj, params)
    assert z.shape == (N, latent_dim)
    err = float(jnp.max(jnp.abs(z - z_ref)))
    assert err < 1e-3, f"mismatch vs reference: max abs err {err}"

    print("KERNEL_OK")
</pallas_src>

<mosaic_0001>
module attributes {stable_mosaic.version = 11 : i64} {
  func.func @_projection_kernel(%arg0: i32, %arg1: memref<128x128xf32, #tpu.memory_space<vmem>>, %arg2: memref<128x128xf32, #tpu.memory_space<vmem>>, %arg3: memref<1x128xf32, #tpu.memory_space<vmem>>, %arg4: memref<1x128xf32, #tpu.memory_space<vmem>>, %arg5: memref<128x128xf32, #tpu.memory_space<vmem>>, %arg6: memref<128x1xf32, #tpu.memory_space<vmem>>, %arg7: memref<1x128xf32, #tpu.memory_space<vmem>>) attributes {dimension_semantics = [#tpu.dimension_semantics<parallel>], iteration_bounds = array<i64: 2>, scalar_prefetch = 0 : i64, scratch_operands = 0 : i64, tpu.core_type = #tpu.core_type<tc>, window_params = [{transform_indices = @transform_0, window_bounds = array<i64: 128, 128>}, {pipeline_mode = #tpu.pipeline_mode<synchronous>, transform_indices = @transform_1, window_bounds = array<i64: 128, 128>}, {pipeline_mode = #tpu.pipeline_mode<synchronous>, transform_indices = @transform_2, window_bounds = array<i64: 1, 128>}, {pipeline_mode = #tpu.pipeline_mode<synchronous>, transform_indices = @transform_3, window_bounds = array<i64: 1, 128>}, {transform_indices = @transform_4, window_bounds = array<i64: 128, 128>}, {transform_indices = @transform_5, window_bounds = array<i64: 128, 1>}, {transform_indices = @transform_6, window_bounds = array<i64: 1, 128>}]} {
    %c0 = arith.constant 0 : index
    %c0_0 = arith.constant 0 : index
    %0 = vector.load %arg1[%c0, %c0_0] : memref<128x128xf32, #tpu.memory_space<vmem>>, vector<128x128xf32>
    %c0_1 = arith.constant 0 : index
    %c0_2 = arith.constant 0 : index
    %1 = vector.load %arg2[%c0_1, %c0_2] : memref<128x128xf32, #tpu.memory_space<vmem>>, vector<128x128xf32>
    %cst = arith.constant dense<0.000000e+00> : vector<128x128xf32>
    %2 = tpu.matmul %0, %1, %cst {dimension_numbers = #tpu.dot_dimension_numbers<[1], [0], [0], [1], [0, 0, 1, 1], [], []>} : vector<128x128xf32>, vector<128x128xf32>, vector<128x128xf32> -> vector<128x128xf32>
    %c0_3 = arith.constant 0 : index
    %c0_4 = arith.constant 0 : index
    %3 = vector.load %arg5[%c0_3, %c0_4] : memref<128x128xf32, #tpu.memory_space<vmem>>, vector<128x128xf32>
    tpu.vector_store %arg5[%c0_3, %c0_4], %2 {strides = array<i32>} : memref<128x128xf32, #tpu.memory_space<vmem>>, vector<128x128xf32>,
    %c0_5 = arith.constant 0 : index
    %c0_6 = arith.constant 0 : index
    %4 = vector.load %arg3[%c0_5, %c0_6] : memref<1x128xf32, #tpu.memory_space<vmem>>, vector<1x128xf32>
    %cst_7 = arith.constant dense<0.000000e+00> : vector<128x1xf32>
    %5 = tpu.matmul %2, %4, %cst_7 {dimension_numbers = #tpu.dot_dimension_numbers<[1], [1], [0], [0], [0, 0, 1, 0], [], []>} : vector<128x128xf32>, vector<1x128xf32>, vector<128x1xf32> -> vector<128x1xf32>
    %c0_8 = arith.constant 0 : index
    %c0_9 = arith.constant 0 : index
    %6 = vector.load %arg6[%c0_8, %c0_9] : memref<128x1xf32, #tpu.memory_space<vmem>>, vector<128x1xf32>
    tpu.vector_store %arg6[%c0_8, %c0_9], %5 {strides = array<i32>} : memref<128x1xf32, #tpu.memory_space<vmem>>, vector<128x1xf32>,
    %c0_10 = arith.constant 0 : index
    %c0_11 = arith.constant 0 : index
    %7 = vector.load %arg4[%c0_10, %c0_11] : memref<1x128xf32, #tpu.memory_space<vmem>>, vector<1x128xf32>
    %cst_12 = arith.constant dense<0.000000e+00> : vector<1x128xf32>
    %8 = tpu.matmul %7, %2, %cst_12 {dimension_numbers = #tpu.dot_dimension_numbers<[1], [1], [0], [0], [0, 0, 1, 0], [], []>} : vector<1x128xf32>, vector<128x128xf32>, vector<1x128xf32> -> vector<1x128xf32>
    %c0_13 = arith.constant 0 : index
    %c0_14 = arith.constant 0 : index
    %9 = vector.load %arg7[%c0_13, %c0_14] : memref<1x128xf32, #tpu.memory_space<vmem>>, vector<1x128xf32>
    tpu.vector_store %arg7[%c0_13, %c0_14], %8 {strides = array<i32>} : memref<1x128xf32, #tpu.memory_space<vmem>>, vector<1x128xf32>,
    return
  }
  func.func @transform_0(%arg0: i32) -> (i32, i32) {
    %c0_i32 = arith.constant 0 : i32
    %c0_i32_0 = arith.constant 0 : i32
    return %arg0, %c0_i32 : i32, i32
  }
  func.func @transform_1(%arg0: i32) -> (i32, i32) {
    %c0_i32 = arith.constant 0 : i32
    %c0_i32_0 = arith.constant 0 : i32
    %c0_i32_1 = arith.constant 0 : i32
    return %c0_i32, %c0_i32_0 : i32, i32
  }
  func.func @transform_2(%arg0: i32) -> (i32, i32) {
    %c0_i32 = arith.constant 0 : i32
    %c0_i32_0 = arith.constant 0 : i32
    %c0_i32_1 = arith.constant 0 : i32
    return %c0_i32, %c0_i32_0 : i32, i32
  }
  func.func @transform_3(%arg0: i32) -> (i32, i32) {
    %c0_i32 = arith.constant 0 : i32
    %c0_i32_0 = arith.constant 0 : i32
    %c0_i32_1 = arith.constant 0 : i32
    return %c0_i32, %c0_i32_0 : i32, i32
  }
  func.func @transform_4(%arg0: i32) -> (i32, i32) {
    %c0_i32 = arith.constant 0 : i32
    %c0_i32_0 = arith.constant 0 : i32
    return %arg0, %c0_i32 : i32, i32
  }
  func.func @transform_5(%arg0: i32) -> (i32, i32) {
    %c0_i32 = arith.constant 0 : i32
    %c0_i32_0 = arith.constant 0 : i32
    return %arg0, %c0_i32 : i32, i32
  }
  func.func @transform_6(%arg0: i32) -> (i32, i32) {
    %c0_i32 = arith.constant 0 : i32
    %c0_i32_0 = arith.constant 0 : i32
    return %c0_i32, %arg0 : i32, i32
  }
}

</mosaic_0001>

<bundles_post_ra>
// kernel: tpu_custom_call.1
= control target key start
LH: loop header
LB: loop body
LE: loop exit
PB: predicated region body
PF: predicated region fallthrough
CT: control target
= control target key end

     0   :  { %12 = vsyncpa [#allocation3], 0  ;;  %s1671_s0 = inlined_call_operand.hbm [shape: f32[256,128], index: 0, kind: input, shape index: {}]   ;;  %s1672_s1 = inlined_call_operand.hbm [shape: f32[128,128], index: 1, kind: input, shape index: {}]   ;;  %s1673_s2 = inlined_call_operand.vmem [shape: f32[1,128], index: 2, kind: input, shape index: {}]   ;;  %s1674_s3 = inlined_call_operand.vmem [shape: f32[1,128], index: 3, kind: input, shape index: {}]   ;;  %s1675_s4 = inlined_call_operand.hbm [shape: f32[256,128], index: 4, kind: output, shape index: {0}]   ;;  %s1676_s5 = inlined_call_operand.vmem [shape: f32[256,1], index: 5, kind: output, shape index: {1}]   ;;  %s1677_s6 = inlined_call_operand.hbm [shape: f32[1,256], index: 6, kind: output, shape index: {2}]  }
   0x1   :  { %14 = vsyncpa [#allocation3 + $0x1], 0 }
   0x2   :  { %15 = vsyncpa [#allocation6], 0 }
   0x3   :  { %16 = vsyncpa [#allocation4], 0 }
   0x4   :  { %18 = vsyncpa [#allocation4 + $0x1], 0 }
   0x5   :  { %19 = vsyncpa [#allocation9], 0 }
   0x6   :  { %21 = vsyncpa [#allocation9 + $0x1], 0  ;;  %s1318_s21 = smov 0   ;;  %s1320_s22 = smov 0  }
   0x7   :  { %s1322_s23 = smov 0   ;;  %s1324_s24 = smov 0  }
   0x8 LB: > { %s1339_s25 = sadd.s32 4294967295, %s1270_s24   ;;  %s823_s26 = sadd.s32 4294967294, %s1270_s24   ;;  %s1270_s24 = sphi %s1324_s24, %s1697_s24   ;;  %s1266_s23 = sphi %s1322_s23, %s1696_s23   ;;  %s1262_s22 = sphi %s1320_s22, %s1695_s22   ;;  %s1258_s21 = sphi %s1318_s21, %s1694_s21  }
   0x9   : > { %p47_p0 = scmp.ne.s32.totalorder %s1262_s22, %s1258_s21  ;;  %p1678_p1 = scmp.eq.s32.totalorder %s1339_s25, 0 }
   0xa   : > { %p140_p3 = scmp.eq.s32.totalorder %s823_s26, 1  ;;  %p824_p5 = scmp.ge.s32.totalorder %s1270_s24, 1 }
   0xb   : > { %p1348_p4 = por %p1678_p1, %p47_p0  ;;  %p199_p7 = scmp.lt.s32.totalorder %s1270_s24, 3 }
   0xc   : > { %p1353_p6 = por %p140_p3, %p47_p0  ;;  %s1272_s30 = smov [#allocation5]  }
   0xd   : > { %s1681_s27 = scalar_select %p1348_p4, 1, 0 }
   0xe   : > { %s1682_s28 = scalar_select %p1353_p6, 1, 0 }
   0xf   : > { %p1358_p8 = pnand %p824_p5, %p199_p7  ;;  %s211_s7 = sshll.u32 %s1272_s30, 4  ;;  %s1362_s7 = int_to_ptr.vmem [resolvable:$true] %s211_s7 }
  0x10   : > { %s1374_s9 = sadd.s32 1, %s1270_s24   ;;  %s34_s10 = sadd.s32 1, %s1266_s23 }
  0x11   : > { %s1683_s29 = scalar_select %p1358_p8, 1, 0 }
  0x12   : > { %p1051_p9 = pneg %p1358_p8  ;;  %s31_s11 = ssub.s32 %s1270_s24, %s1374_s9 }
  0x13   : > { %s1110_s14 = scalar_lea.hbm %s1672_s1, 2048 }
  0x14   : > { %p1369_p11 = pnand %p1051_p9, %p1678_p1  ;;  %p1111_p12 = scmp.ne.s32.totalorder %s1672_s1, %s1110_s14 }
  0x15   : > { %p1117_p5 = scmp.lt.u32.totalorder %s1110_s14, %s1672_s1 }
  0x16   : > { %p1112_p13 = pneg %p1369_p11 }
  0x18   : > { %p1113_p0 = pnand %p1112_p13, %p1111_p12 }
  0x1a   : > { %p1114_p3 = pneg %p1113_p0 }
  0x1c   : > { %p1119_p7 = pnand %p1117_p5, %p1114_p3 }
  0x1e   : > { %1122 = shalt.err (!%p1119_p7)
}
  0x1f   : > { %s1123_s19 = scalar_lea.vmem %s1362_s7, 2048  ;;  %p1131_p2 = scmp.lt.s32.totalorder %s1362_s7, %s1362_s7 }
  0x20   : > { %p1124_p9 = scmp.ne.s32.totalorder %s1362_s7, %s1123_s19  ;;  %p1132_p6 = scmp.lt.s32.totalorder %s1123_s19, %s1123_s19 }
  0x22   : > { %p1126_p10 = pnand %p1124_p9, %p1112_p13  ;;  %p1133_p4 = por %p1132_p6, %p1131_p2 }
  0x24   : > { %p1127_p1 = pneg %p1126_p10 }
  0x26   : > { %p1134_p8 = pnand %p1133_p4, %p1127_p1 }
  0x28   : > { %1137 = shalt.err (!%p1134_p8)
}
  0x29   : > { %s1273_s20 = smov 128   ;;  %s1274_s26 = smov 8  }
  0x2a   : > { %1054 = dma.hbm_to_vmem [thread:$0]  (!%p1369_p11), %s1672_s1, 2048, %s1362_s7, [#allocation6], %s1273_s20, %s1273_s20, %s1274_s26  }
  0x2b   : > { %p32_p1 = scmp.eq.s32.totalorder %s31_s11, 0  ;;  %p41_p2 = scmp.ne.s32.totalorder %s1266_s23, %s1262_s22 }
  0x2c   : > { %p42_p4 = scmp.eq.s32.totalorder %s1270_s24, 0  ;;  %p1067_p6 = scmp.lt.s32.totalorder %s1270_s24, 2 }
  0x2d   : > { %s1408_s13 = scalar_select %p32_p1, %s1266_s23, %s34_s10  }
  0x2e   : > { %p43_p8 = por %p42_p4, %p41_p2  ;;  %p1685_p10 = scmp.eq.s32.totalorder %s1339_s25, 1 }
  0x2f   : > { %s231_s8 = sand.u32 1, %s1266_s23   ;;  %s843_s15 = sshll.u32 %s1270_s24, 11 }
  0x30   : > { %p1412_p12 = por %p1685_p10, %p41_p2  ;;  %s827_s16 = sshll.u32 %s231_s8, 7 }
  0x31   : > { %s1421_s19 = scalar_lea.hbm %s1671_s0, %s843_s15  ;;  %s235_s7 = scalar_lea.vmem [#allocation2], %s827_s16 }
  0x32   : > { %s242_s10 = sshll.u32 %s235_s7, 4  ;;  %p1423_p11 = pnand %p1067_p6, %p43_p8  ;;  %s1427_s10 = int_to_ptr.vmem [resolvable:$true] %s242_s10 }
  0x33   : > { %s1429_s30 = scalar_lea.sflag [#allocation3], %s231_s8  ;;  %s1138_s12 = scalar_lea.hbm %s1421_s19, 2048 }
  0x34   : > { %p1139_p13 = scmp.ne.s32.totalorder %s1421_s19, %s1138_s12  ;;  %p1140_p0 = pneg %p1423_p11 }
  0x35   : > { %s1143_s17 = scalar_lea.hbm %s1671_s0, 4096  ;;  %p1144_p7 = scmp.lt.u32.totalorder %s1421_s19, %s1671_s0 }
  0x36   : > { %p1141_p3 = pnand %p1140_p0, %p1139_p13  ;;  %p1145_p9 = scmp.lt.u32.totalorder %s1143_s17, %s1138_s12 }
  0x37   : > { %p1147_p2 = scmp.lt.u32.totalorder %s1138_s12, %s1421_s19 }
  0x38   : > { %p1142_p5 = pneg %p1141_p3  ;;  %p1146_p1 = por %p1145_p9, %p1144_p7 }
  0x3a   : > { %p1148_p4 = por %p1147_p2, %p1146_p1 }
  0x3c   : > { %p1149_p6 = pnand %p1148_p4, %p1142_p5 }
  0x3e   : > { %1152 = shalt.err (!%p1149_p6)
}
  0x3f   : > { %s1153_s8 = scalar_lea.vmem %s1427_s10, 2048  ;;  %s1275_s15 = smov [#allocation2]  }
  0x40   : > { %p1154_p8 = scmp.ne.s32.totalorder %s1427_s10, %s1153_s8  ;;  %s1158_s16 = sshll.u32 %s1275_s15, 4  ;;  %s1159_s16 = int_to_ptr.vmem [resolvable:$false] %s1158_s16 }
  0x41   : > { %s1160_s18 = scalar_lea.vmem %s1159_s16, 4096  ;;  %p1161_p3 = scmp.lt.s32.totalorder %s1427_s10, %s1159_s16 }
  0x42   : > { %p1156_p10 = pnand %p1154_p8, %p1140_p0  ;;  %p1162_p7 = scmp.lt.s32.totalorder %s1160_s18, %s1153_s8 }
  0x44   : > { %p1157_p13 = pneg %p1156_p10  ;;  %p1163_p9 = por %p1162_p7, %p1161_p3 }
  0x46   : > { %p1164_p1 = pnand %p1163_p9, %p1157_p13 }
  0x48   : > { %1167 = shalt.err (!%p1164_p1)
}
  0x49   : > { %1058 = dma.hbm_to_vmem [thread:$0]  (!%p1423_p11), %s1421_s19, 2048, %s1427_s10, %s1429_s30, %s1273_s20, %s1273_s20, %s1274_s26  }
  0x4a   : > { %p1688_p0 = scmp.ne.s32.totalorder %s1683_s29, 0 }
  0x4b   : > { %s1463_s12 = sand.u32 (!%p1688_p0), 1, %s1262_s22   ;;  %p1689_p5 = scmp.ne.s32.totalorder (!%p1688_p0), %s1681_s27, 0 }
  0x4c   : > { %254 = sbr.rel (%p1688_p0) target bundleno = 626 (0x272), region = 36  ;;  %s831_s17 = sshll.u32 (!%p1688_p0), %s1463_s12, 7 }
  0x4d   : > { %s257_s7 = scalar_lea.sflag (!%p1688_p0), [#allocation3], %s1463_s12  ;;  %s1469_s11 = scalar_lea.vmem (!%p1688_p0), [#allocation2], %s831_s17 }
  0x53   : > { %1241 = dma.done.wait (%p1689_p5), %s257_s7, 2048  }
  0x54   : > { %1243 = vsyncadd (%p1689_p5), %s257_s7, 4294965248  ;;  %p1690_p11 = scmp.eq.s32.totalorder %s1339_s25, 0 }
  0x56   : > { %1245 = dma.done.wait (%p1690_p11), [#allocation6], 2048   ;;  %p1691_p2 = pmov %p1690_p11 }
  0x57   : > { %v326_v0 = vld [vmem:[#allocation5] sm:$0xff]  ;;  %v327_v1 = vld [vmem:[#allocation5 + $0x8] sm:$0xff]  ;;  %v328_v2 = vld [vmem:[#allocation5 + $0x10] sm:$0xff]  ;;  %v1276_v40 = vmov 0.0|0.0   ;;  %vm1277_vm0 = vmmov 0   ;;  %v1278_v41 = vmov 0.0  }
  0x58   : > { %1247 = vsyncadd (%p1691_p2), [#allocation6], 4294965248  ;;  %v985_v3 = vpack.c.bf16 %v327_v1, %v326_v0  ;;  %v329_v4 = vld [vmem:[#allocation5 + $0x18] sm:$0xff]  ;;  %v330_v6 = vld [vmem:[#allocation5 + $0x20] sm:$0xff]  ;;  %1017 = vmatprep.subr.bf16.mxu1 %v1276_v40  ;;  %982 = vmatprep.mubr.msk.f32.mxu1 %vm1277_vm0, %v1278_v41  ;;  %s1503_s20 = scalar_lea.vmem [#allocation7], %s831_s17  ;;  %s1548_s10 = sshll.u32 %s1339_s25, 4 }
  0x59   : > { %v989_v5 = vpack.c.bf16 %v329_v4, %v328_v2  ;;  %v331_v7 = vld [vmem:[#allocation5 + $0x28] sm:$0xff]  ;;  %v310_v9 = vld [vmem:[%s1469_s11] sm:$0xff]  ;;  %v332_v10 = vld [vmem:[#allocation5 + $0x30] sm:$0xff]  ;;  %p305_p4 = scmp.lt.s32.totalorder %s1548_s10, 31  ;;  %vm558_vm1 = vcmask 7168   ;;  %s844_s17 = sshll.u32 %s1339_s25, 11 }
  0x5a   : > { %986 = vmatprep.subr.bf16.mxu0 %v985_v3  ;;  %v993_v8 = vpack.c.bf16 %v331_v7, %v330_v6  ;;  %v333_v11 = vld [vmem:[#allocation5 + $0x38] sm:$0xff]  ;;  %926 = vmatprep.mubr.f32.mxu0 %v310_v9  ;;  %v334_v13 = vld [vmem:[#allocation5 + $0x40] sm:$0xff]  ;;  %v335_v14 = vld [vmem:[#allocation5 + $0x48] sm:$0xff]  ;;  %s1567_s27 = scalar_lea.hbm %s1675_s4, %s844_s17  ;;  %s670_s29 = sshll.u32 %s1503_s20, 4  ;;  %s1572_s29 = int_to_ptr.vmem [resolvable:$true] %s670_s29 }
  0x5b   : > { %988 = vmatpush3.bf16.msra.mxu0 %v985_v3  ;;  %v997_v12 = vpack.c.bf16 %v333_v11, %v332_v10  ;;  %v1001_v15 = vpack.c.bf16 %v335_v14, %v334_v13  ;;  %v336_v16 = vld [vmem:[#allocation5 + $0x50] sm:$0xff]  ;;  %v337_v17 = vld [vmem:[#allocation5 + $0x58] sm:$0xff]  ;;  %v338_v19 = vld [vmem:[#allocation5 + $0x60] sm:$0xff]  ;;  %s306_s30 = scalar_select %p305_p4, %s1548_s10, 31 }
  0x5c   : > { %990 = vmatprep.subr.bf16.mxu0 %v989_v5  ;;  %v1005_v18 = vpack.c.bf16 %v337_v17, %v336_v16  ;;  %v339_v20 = vld [vmem:[#allocation5 + $0x68] sm:$0xff]  ;;  %v340_v22 = vld [vmem:[#allocation5 + $0x70] sm:$0xff]  ;;  %v341_v23 = vld [vmem:[#allocation5 + $0x78] sm:$0xff]  ;;  %s648_s26 = scalar_lea.sflag [#allocation4], %s1463_s12  ;;  %s1168_s19 = scalar_lea.vmem %s1572_s29, 2048 }
  0x5d   : > { %v1009_v21 = vpack.c.bf16 %v339_v20, %v338_v19  ;;  %v1013_v24 = vpack.c.bf16 %v341_v23, %v340_v22  ;;  %v311_v25 = vld [vmem:[%s1469_s11 + $0x8] sm:$0xff]  ;;  %v312_v26 = vld [vmem:[%s1469_s11 + $0x10] sm:$0xff]  ;;  %v313_v27 = vld [vmem:[%s1469_s11 + $0x18] sm:$0xff]  ;;  %s835_s8 = sshll.u32 %s306_s30, 3  ;;  %p1169_p6 = scmp.ne.s32.totalorder %s1572_s29, %s1168_s19 }
  0x5e   : > { %v314_v28 = vld [vmem:[%s1469_s11 + $0x20] sm:$0xff]  ;;  %v315_v29 = vld [vmem:[%s1469_s11 + $0x28] sm:$0xff]  ;;  %v316_v30 = vld [vmem:[%s1469_s11 + $0x30] sm:$0xff]  ;;  %s1555_s18 = scalar_lea.vmem %s1676_s5, %s835_s8  ;;  %s1279_s25 = smov [#allocation7]  }
  0x5f   : > { %992 = vmatpush3.bf16.msra.mxu0 %v989_v5  ;;  %v317_v31 = vld [vmem:[%s1469_s11 + $0x38] sm:$0xff]  ;;  %v318_v32 = vld [vmem:[%s1469_s11 + $0x40] sm:$0xff]  ;;  %v319_v33 = vld [vmem:[%s1469_s11 + $0x48] sm:$0xff]  ;;  %p1170_p8 = pnand %p1169_p6, %p1412_p12  ;;  %s1172_s30 = sshll.u32 %s1279_s25, 4  ;;  %s1173_s30 = int_to_ptr.vmem [resolvable:$false] %s1172_s30 }
  0x60   : > { %994 = vmatprep.subr.bf16.mxu0 %v993_v8  ;;  %v320_v34 = vld [vmem:[%s1469_s11 + $0x50] sm:$0xff]  ;;  %v321_v35 = vld [vmem:[%s1469_s11 + $0x58] sm:$0xff]  ;;  %v322_v36 = vld [vmem:[%s1469_s11 + $0x60] sm:$0xff]  ;;  %p1175_p13 = scmp.lt.s32.totalorder %s1572_s29, %s1173_s30 }
  0x61   : > { %v323_v37 = vld [vmem:[%s1469_s11 + $0x68] sm:$0xff]  ;;  %v324_v38 = vld [vmem:[%s1469_s11 + $0x70] sm:$0xff]  ;;  %v325_v39 = vld [vmem:[%s1469_s11 + $0x78] sm:$0xff]  ;;  %p1171_p10 = pneg %p1170_p8 }
  0x62   : > { %v1499_v42 = vld [vmem:[%s1673_s2] ss:$0 sm:$0xff] }
  0x63   : > { %996 = vmatpush3.bf16.msra.mxu0 %v993_v8  ;;  %v575_v19 = vld [vmem:[%s1674_s3] sm:$0x1] }
  0x64   : > { %998 = vmatprep.subr.bf16.mxu0 %v997_v12 }
  0x67   : > { %1000 = vmatpush3.bf16.msra.mxu0 %v997_v12 }
  0x68   : > { %1002 = vmatprep.subr.bf16.mxu0 %v1001_v15 }
  0x6b   : > { %1004 = vmatpush3.bf16.msra.mxu0 %v1001_v15 }
  0x6c   : > { %1006 = vmatprep.subr.bf16.mxu0 %v1005_v18 }
  0x6f   : > { %1008 = vmatpush3.bf16.msra.mxu0 %v1005_v18 }
  0x70   : > { %1010 = vmatprep.subr.bf16.mxu0 %v1009_v21 }
  0x73   : > { %1012 = vmatpush3.bf16.msra.mxu0 %v1009_v21 }
  0x74   : > { %1014 = vmatprep.subr.bf16.mxu0 %v1013_v24 }
  0x77   : > { %1016 = vmatpush3.bf16.msra.mxu0 %v1013_v24 }
  0x7a   : > { %927 = vmatmul.mubr.f32.vlgmr.msra.gmra.mrb[0].mxu0 %v311_v25 }
  0x7b   : > { %929 = vmatprep.mubr.f32.mxu0 %v312_v26 }
  0x7e   : > { %930 = vmatmul.mubr.f32.gmra.mrb[2].mxu0 %v313_v27 }
  0x7f   : > { %932 = vmatprep.mubr.f32.mxu0 %v314_v28 }
  0x82   : > { %933 = vmatmul.mubr.f32.gmra.mrb[4].mxu0 %v315_v29 }
  0x83   : > { %935 = vmatprep.mubr.f32.mxu0 %v316_v30 }
  0x86   : > { %936 = vmatmul.mubr.f32.gmra.mrb[6].mxu0 %v317_v31 }
  0x87   : > { %938 = vmatprep.mubr.f32.mxu0 %v318_v32 }
  0x8a   : > { %939 = vmatmul.mubr.f32.gmra.mrb[8].mxu0 %v319_v33 }
  0x8b   : > { %941 = vmatprep.mubr.f32.mxu0 %v320_v34 }
  0x8e   : > { %942 = vmatmul.mubr.f32.gmra.mrb[10].mxu0 %v321_v35 }
  0x8f   : > { %944 = vmatprep.mubr.f32.mxu0 %v322_v36 }
  0x92   : > { %945 = vmatmul.mubr.f32.gmra.mrb[12].mxu0 %v323_v37 }
  0x93   : > { %947 = vmatprep.mubr.f32.mxu0 %v324_v38 }
  0x96   : > { %948 = vmatmul.mubr.f32.gmra.mrb[14].mxu0 %v325_v39 }
 0x14d   : > { %v928_v43 = vpop.f32.mrb[0].mxu0 }
 0x14e   : > { %488 = vst [vmem:[%s1503_s20 + $0x8] sm:$0xff] %v928_v43  ;;  %v408_v44 = vpop.f32.mrb[1].mxu0  ;;  %v511_v45 = vmul.f32 %v928_v43, %v1499_v42 }
 0x14f   : > { %487 = vst [vmem:[%s1503_s20] sm:$0xff] %v408_v44  ;;  %v1018_v46 = vpack.c.bf16 %v928_v43, %v408_v44  ;;  %v510_v48 = vmul.f32 %v1499_v42, %v408_v44 }
 0x150   : > { %528 = vadd.xlane.f32.xlu0 %v511_v45 }
 0x151   : > { %v931_v47 = vpop.f32.mrb[2].mxu0  ;;  %1019 = vmatpush3.bf16.xpose.msra.mxu1 %v1018_v46 }
 0x152   : > { %490 = vst [vmem:[%s1503_s20 + $0x18] sm:$0xff] %v931_v47  ;;  %v513_v49 = vmul.f32 %v931_v47, %v1499_v42  ;;  %v418_v50 = vpop.f32.mrb[3].mxu0  ;;  %1020 = vmatprep.subr.bf16.mxu1 %v1276_v40 }
 0x153   : > { %489 = vst [vmem:[%s1503_s20 + $0x10] sm:$0xff] %v418_v50  ;;  %v1021_v51 = vpack.c.bf16 %v931_v47, %v418_v50  ;;  %v512_v52 = vmul.f32 %v1499_v42, %v418_v50 }
 0x154   : > { %526 = vadd.xlane.f32.xlu0 %v510_v48  ;;  %532 = vadd.xlane.f32.xlu1 %v513_v49 }
 0x155   : > { %v934_v53 = vpop.f32.mrb[4].mxu0 }
 0x156   : > { %492 = vst [vmem:[%s1503_s20 + $0x28] sm:$0xff] %v934_v53  ;;  %v428_v54 = vpop.f32.mrb[5].mxu0  ;;  %v515_v57 = vmul.f32 %v934_v53, %v1499_v42 }
 0x157   : > { %491 = vst [vmem:[%s1503_s20 + $0x20] sm:$0xff] %v428_v54  ;;  %v1024_v55 = vpack.c.bf16 %v934_v53, %v428_v54  ;;  %v514_v56 = vmul.f32 %v1499_v42, %v428_v54 }
 0x158   : > { %530 = vadd.xlane.f32.xlu1 %v512_v52 }
 0x159   : > { %1022 = vmatpush3.bf16.xpose.msra.mxu1 %v1021_v51  ;;  %534 = vadd.xlane.f32.xlu0 %v514_v56  ;;  %v937_v58 = vpop.f32.mrb[6].mxu0 }
 0x15a   : > { %1023 = vmatprep.subr.bf16.mxu1 %v1276_v40  ;;  %494 = vst [vmem:[%s1503_s20 + $0x38] sm:$0xff] %v937_v58  ;;  %v438_v59 = vpop.f32.mrb[7].mxu0  ;;  %v517_v62 = vmul.f32 %v937_v58, %v1499_v42 }
 0x15b   : > { %493 = vst [vmem:[%s1503_s20 + $0x30] sm:$0xff] %v438_v59  ;;  %v1027_v60 = vpack.c.bf16 %v937_v58, %v438_v59  ;;  %v516_v61 = vmul.f32 %v1499_v42, %v438_v59 }
 0x15c   : > { %536 = vadd.xlane.f32.xlu1 %v515_v57 }
 0x15d   : > { %538 = vadd.xlane.f32.xlu0 %v516_v61  ;;  %v940_v63 = vpop.f32.mrb[8].mxu0 }
 0x15e   : > { %496 = vst [vmem:[%s1503_s20 + $0x48] sm:$0xff] %v940_v63  ;;  %v448_v0 = vpop.f32.mrb[9].mxu0  ;;  %v519_v3 = vmul.f32 %v940_v63, %v1499_v42 }
 0x15f   : > { %495 = vst [vmem:[%s1503_s20 + $0x40] sm:$0xff] %v448_v0  ;;  %v1030_v1 = vpack.c.bf16 %v940_v63, %v448_v0  ;;  %v518_v2 = vmul.f32 %v1499_v42, %v448_v0 }
 0x160   : > { %540 = vadd.xlane.f32.xlu1 %v517_v62 }
 0x161   : > { %1025 = vmatpush3.bf16.xpose.msra.mxu1 %v1024_v55  ;;  %542 = vadd.xlane.f32.xlu0 %v518_v2  ;;  %v943_v4 = vpop.f32.mrb[10].mxu0 }
 0x162   : > { %1026 = vmatprep.subr.bf16.mxu1 %v1276_v40  ;;  %498 = vst [vmem:[%s1503_s20 + $0x58] sm:$0xff] %v943_v4  ;;  %v458_v5 = vpop.f32.mrb[11].mxu0  ;;  %v521_v8 = vmul.f32 %v943_v4, %v1499_v42 }
 0x163   : > { %497 = vst [vmem:[%s1503_s20 + $0x50] sm:$0xff] %v458_v5  ;;  %v1033_v6 = vpack.c.bf16 %v943_v4, %v458_v5  ;;  %v520_v7 = vmul.f32 %v1499_v42, %v458_v5 }
 0x164   : > { %544 = vadd.xlane.f32.xlu1 %v519_v3 }
 0x165   : > { %546 = vadd.xlane.f32.xlu0 %v520_v7  ;;  %v946_v9 = vpop.f32.mrb[12].mxu0 }
 0x166   : > { %500 = vst [vmem:[%s1503_s20 + $0x68] sm:$0xff] %v946_v9  ;;  %v468_v10 = vpop.f32.mrb[13].mxu0  ;;  %v523_v13 = vmul.f32 %v946_v9, %v1499_v42 }
 0x167   : > { %499 = vst [vmem:[%s1503_s20 + $0x60] sm:$0xff] %v468_v10  ;;  %v1036_v11 = vpack.c.bf16 %v946_v9, %v468_v10  ;;  %v522_v12 = vmul.f32 %v1499_v42, %v468_v10 }
 0x168   : > { %548 = vadd.xlane.f32.xlu1 %v521_v8 }
 0x169   : > { %1028 = vmatpush3.bf16.xpose.msra.mxu1 %v1027_v60  ;;  %550 = vadd.xlane.f32.xlu0 %v522_v12  ;;  %v949_v14 = vpop.f32.mrb[14].mxu0 }
 0x16a   : > { %1029 = vmatprep.subr.bf16.mxu1 %v1276_v40  ;;  %502 = vst [vmem:[%s1503_s20 + $0x78] sm:$0xff] %v949_v14  ;;  %v478_v15 = vpop.f32.mrb[15].mxu0  ;;  %v525_v18 = vmul.f32 %v949_v14, %v1499_v42 }
 0x16b   : > { %501 = vst [vmem:[%s1503_s20 + $0x70] sm:$0xff] %v478_v15  ;;  %v1039_v16 = vpack.c.bf16 %v949_v14, %v478_v15  ;;  %v524_v17 = vmul.f32 %v1499_v42, %v478_v15  ;;  %s1174_s20 = scalar_lea.vmem %s1173_s30, 4096 }
 0x16c   : > { %552 = vadd.xlane.f32.xlu1 %v523_v13  ;;  %p1176_p3 = scmp.lt.s32.totalorder %s1174_s20, %s1168_s19 }
 0x16d   : > { %554 = vadd.xlane.f32.xlu0 %v524_v17 }
 0x16e   : > { %p1177_p7 = por %p1176_p3, %p1175_p13 }
 0x170   : > { %556 = vadd.xlane.f32.xlu1 %v525_v18  ;;  %p1178_p9 = pnand %p1177_p7, %p1171_p10 }
 0x171   : > { %1031 = vmatpush3.bf16.xpose.msra.mxu1 %v1030_v1 }
 0x172   : > { %1032 = vmatprep.subr.bf16.mxu1 %v1276_v40 }
 0x179   : > { %1034 = vmatpush3.bf16.xpose.msra.mxu1 %v1033_v6 }
 0x17a   : > { %1035 = vmatprep.subr.bf16.mxu1 %v1276_v40 }
 0x181   : > { %1037 = vmatpush3.bf16.xpose.msra.mxu1 %v1036_v11 }
 0x182   : > { %1038 = vmatprep.subr.bf16.mxu1 %v1276_v40 }
 0x189   : > { %1040 = vmatpush3.bf16.xpose.msra.mxu1 %v1039_v16 }
 0x190   : > { %983 = vmatmul.mubr.f32.vlgmr.msra.gmra.mrb[0].mxu1 %v575_v19 }
 0x1dd   : > { %v529_v20 = vpop.xlane.xlu0 %528 }
 0x1de   : > { %560 = vst.msk [vmem:[%s1555_s18 + $0x8] sm:$0xff] %vm558_vm1, %v529_v20 }
 0x1e1   : > { %v527_v21 = vpop.xlane.xlu0 %526  ;;  %v533_v22 = vpop.xlane.xlu1 %532 }
 0x1e2   : > { %559 = vst.msk [vmem:[%s1555_s18] sm:$0xff] %vm558_vm1, %v527_v21  ;;  %562 = vst.msk [vmem:[%s1555_s18 + $0x18] sm:$0xff] %vm558_vm1, %v533_v22 }
 0x1e5   : > { %v531_v23 = vpop.xlane.xlu1 %530 }
 0x1e6   : > { %561 = vst.msk [vmem:[%s1555_s18 + $0x10] sm:$0xff] %vm558_vm1, %v531_v23  ;;  %v535_v24 = vpop.xlane.xlu0 %534 }
 0x1e7   : > { %563 = vst.msk [vmem:[%s1555_s18 + $0x20] sm:$0xff] %vm558_vm1, %v535_v24 }
 0x1e8   : > { %1181 = shalt.err (!%p1178_p9)
}
 0x1e9   : > { %s1182_s8 = scalar_lea.hbm %s1567_s27, 2048  ;;  %s1186_s17 = scalar_lea.hbm %s1675_s4, 4096 }
 0x1ea   : > { %p1183_p1 = scmp.ne.s32.totalorder %s1567_s27, %s1182_s8  ;;  %p1187_p11 = scmp.lt.u32.totalorder %s1567_s27, %s1675_s4 }
 0x1eb   : > { %p1188_p2 = scmp.lt.u32.totalorder %s1186_s17, %s1182_s8  ;;  %p1190_p6 = scmp.lt.u32.totalorder %s1182_s8, %s1567_s27 }
 0x1ec   : > { %p1184_p0 = pnand %p1183_p1, %p1412_p12 }
 0x1ed   : > { %p1189_p4 = por %p1188_p2, %p1187_p11 }
 0x1ee   : > { %p1185_p5 = pneg %p1184_p0 }
 0x1ef   : > { %p1191_p8 = por %p1190_p6, %p1189_p4 }
 0x1f1   : > { %p1192_p10 = pnand %p1191_p8, %p1185_p5 }
 0x1f3   : > { %1195 = shalt.err (!%p1192_p10)
}
 0x1f4   : > { %s1280_s19 = smov 128   ;;  %s1281_s25 = smov 8   ;;  %v537_v25 = vpop.xlane.xlu1 %536  ;;  %v539_v26 = vpop.xlane.xlu0 %538 }
 0x1f5   : > { %1047 = dma.vmem_to_hbm [thread:$0]  (%p1412_p12), %s1572_s29, 2048, %s1567_s27, %s648_s26, %s1280_s19, %s1280_s19, %s1281_s25  }
 0x1f6   : > { %564 = vst.msk [vmem:[%s1555_s18 + $0x28] sm:$0xff] %vm558_vm1, %v537_v25  ;;  %565 = vst.msk [vmem:[%s1555_s18 + $0x30] sm:$0xff] %vm558_vm1, %v539_v26  ;;  %s301_s27 = scalar_lea.vmem [#allocation8], %s1463_s12  ;;  %s1629_s20 = scalar_lea.hbm %s1677_s6, %s1548_s10 }
 0x1f7   : > { %s690_s29 = sshll.u32 %s301_s27, 4  ;;  %s658_s8 = scalar_lea.sflag [#allocation9], %s1463_s12  ;;  %s1623_s29 = int_to_ptr.vmem [resolvable:$true] %s690_s29 }
 0x1f8   : > { %v541_v27 = vpop.xlane.xlu1 %540  ;;  %v543_v28 = vpop.xlane.xlu0 %542  ;;  %s1196_s15 = scalar_lea.vmem %s1623_s29, 16 }
 0x1f9   : > { %566 = vst.msk [vmem:[%s1555_s18 + $0x38] sm:$0xff] %vm558_vm1, %v541_v27  ;;  %567 = vst.msk [vmem:[%s1555_s18 + $0x40] sm:$0xff] %vm558_vm1, %v543_v28  ;;  %p1197_p13 = scmp.ne.s32.totalorder %s1623_s29, %s1196_s15 }
 0x1fb   : > { %p1198_p3 = pnand %p1197_p13, %p1412_p12 }
 0x1fc   : > { %v545_v29 = vpop.xlane.xlu1 %544  ;;  %v547_v30 = vpop.xlane.xlu0 %546 }
 0x1fd   : > { %568 = vst.msk [vmem:[%s1555_s18 + $0x48] sm:$0xff] %vm558_vm1, %v545_v29  ;;  %569 = vst.msk [vmem:[%s1555_s18 + $0x50] sm:$0xff] %vm558_vm1, %v547_v30  ;;  %p1199_p7 = pneg %p1198_p3 }
 0x200   : > { %v549_v31 = vpop.xlane.xlu1 %548  ;;  %v551_v32 = vpop.xlane.xlu0 %550 }
 0x201   : > { %570 = vst.msk [vmem:[%s1555_s18 + $0x58] sm:$0xff] %vm558_vm1, %v549_v31  ;;  %571 = vst.msk [vmem:[%s1555_s18 + $0x60] sm:$0xff] %vm558_vm1, %v551_v32 }
 0x204   : > { %v553_v33 = vpop.xlane.xlu1 %552  ;;  %v555_v34 = vpop.xlane.xlu0 %554 }
 0x205   : > { %572 = vst.msk [vmem:[%s1555_s18 + $0x68] sm:$0xff] %vm558_vm1, %v553_v33  ;;  %573 = vst.msk [vmem:[%s1555_s18 + $0x70] sm:$0xff] %vm558_vm1, %v555_v34 }
 0x208   : > { %v557_v35 = vpop.xlane.xlu1 %556 }
 0x209   : > { %574 = vst.msk [vmem:[%s1555_s18 + $0x78] sm:$0xff] %vm558_vm1, %v557_v35  ;;  %s1282_s18 = smov [#allocation8]  }
 0x20a   : > { %s1200_s16 = sshll.u32 %s1282_s18, 4  ;;  %s1201_s16 = int_to_ptr.vmem [resolvable:$false] %s1200_s16 }
 0x20b   : > { %s1202_s17 = scalar_lea.vmem %s1201_s16, 32  ;;  %p1203_p9 = scmp.lt.s32.totalorder %s1623_s29, %s1201_s16 }
 0x20c   : > { %p1204_p1 = scmp.lt.s32.totalorder %s1202_s17, %s1196_s15 }
 0x20e   : > { %p1205_p0 = por %p1204_p1, %p1203_p9 }
 0x210   : > { %p1206_p5 = pnand %p1205_p0, %p1199_p7 }
 0x263   : > { %v642_v36 = vpop.f32.mrb[0].mxu1 }
 0x264   : > { %646 = vst [vmem:[%s301_s27] sm:$0x1] %v642_v36  ;;  %v984_v37 = vpop.f32.mrb[1].mxu1 }
 0x265   : > { %1209 = shalt.err (!%p1206_p5)
}
 0x266   : > { %s1210_s12 = scalar_lea.hbm %s1629_s20, 16  ;;  %s1214_s11 = scalar_lea.hbm %s1677_s6, 32 }
 0x267   : > { %p1211_p11 = scmp.ne.s32.totalorder %s1629_s20, %s1210_s12  ;;  %p1215_p6 = scmp.lt.u32.totalorder %s1629_s20, %s1677_s6 }
 0x268   : > { %p1216_p8 = scmp.lt.u32.totalorder %s1214_s11, %s1210_s12  ;;  %p1218_p13 = scmp.lt.u32.totalorder %s1210_s12, %s1629_s20 }
 0x269   : > { %p1212_p2 = pnand %p1211_p11, %p1412_p12 }
 0x26a   : > { %p1217_p10 = por %p1216_p8, %p1215_p6 }
 0x26b   : > { %p1213_p4 = pneg %p1212_p2 }
 0x26c   : > { %p1219_p3 = por %p1218_p13, %p1217_p10 }
 0x26e   : > { %p1220_p7 = pnand %p1219_p3, %p1213_p4 }
 0x270   : > { %1223 = shalt.err (!%p1220_p7)
}
 0x271   : > { %1048 = dma.vmem_to_hbm [thread:$0]  (%p1412_p12), %s1623_s29, 16, %s1629_s20, %s658_s8  }
 0x272 PF: > { %s702_s27 = sand.u32 1, %s1258_s21   ;;  %p1692_p9 = scmp.ne.s32.totalorder %s1682_s28, 0 }
 0x273   : > { %p1693_p1 = scmp.ge.s32.totalorder %s1270_s24, 2  ;;  %s703_s26 = scalar_lea.sflag [#allocation4], %s702_s27 }
 0x275   : > { %p1060_p0 = pnand %p1693_p1, %p1692_p9 }
 0x277   : > { %1249 = dma.done.wait (!%p1060_p0), %s703_s26, 2048  }
 0x278   : > { %1251 = vsyncadd (!%p1060_p0), %s703_s26, 4294965248  ;;  %s720_s30 = scalar_lea.sflag [#allocation9], %s702_s27 }
 0x279   : > { %1253 = dma.done.wait (!%p1060_p0), %s720_s30, 16  }
 0x27a   : > { %1255 = vsyncadd (!%p1060_p0), %s720_s30, 4294967280  ;;  %p24_p12 = scmp.ge.s32.totalorder %s1374_s9, 4   ;;  %s1694_s21 = smov %s1262_s22 }
 0x27b   : > { %s1695_s22 = smov %s1266_s23  ;;  %s1696_s23 = smov %s1408_s13 }
 0x27c   : > { %s1697_s24 = smov %s1374_s9  ;;  %26 = sbr.rel (!%p24_p12) target bundleno = 8 (0x8), region = 114 }
 0x283   :  { %724 = vsyncpa [#allocation3], 1 }
 0x284   :  { %726 = vsyncpa [#allocation3 + $0x1], 1 }
 0x285   :  { %727 = vsyncpa [#allocation6], 1 }
 0x286   :  { %728 = vsyncpa [#allocation4], 1 }
 0x287   :  { %730 = vsyncpa [#allocation4 + $0x1], 1 }
 0x288   :  { %731 = vsyncpa [#allocation9], 1 }
 0x289   :  { %733 = vsyncpa [#allocation9 + $0x1], 1 }

</bundles_post_ra>
